<compile_context>
chip_gen: v5e
topology: v5e:2x2
jax: 0.10.0
libtpu: 0.0.40
codegen_flags: <defaults>
</compile_context>

<pallas_src>
import functools
import math

import jax
import jax.numpy as jnp
from jax.experimental import pallas as pl
from jax.experimental.pallas import tpu as pltpu


def _attn_pool_kernel(x_ref, pos_tok_ref, pos_mean_ref, wkv_ref, bkv_ref,
                      wqkv_ref, bqkv_ref, hmask_ref, hmask_t_ref, wc_ref,
                      bc_ref, o_ref, *, num_heads, head_dim):
    # x_ref:        (B, C, HW)   token tile in native NCHW-flattened layout
    # pos_tok_ref:  (HW, C)      positional embedding rows 1..HW
    # pos_mean_ref: (1, C)       positional embedding row 0 (mean/query token)
    # wkv_ref:      (C, 2C)      [Wk^T | Wv^T]        (token rows only need K/V)
    # bkv_ref:      (1, 2C)      [bk | bv]            (f32)
    # wqkv_ref:     (C, 3C)      [Wq^T | Wk^T | Wv^T] (mean-token row only)
    # bqkv_ref:     (1, 3C)      [bq | bk | bv]       (f32)
    # hmask_ref:    (C, nh)      0/1 head membership
    # hmask_t_ref:  (nh, C)      transposed head membership
    # wc_ref:       (out, C)     c_proj weight in its original (out, in) layout
    # bc_ref:       (out, 1)     c_proj bias as a column
    # o_ref:        (out, B)     pooled outputs, transposed -> lane-dense store
    B, C, HW = x_ref.shape
    nh = num_heads
    scale = 1.0 / math.sqrt(head_dim)
    f32 = jnp.float32

    x = x_ref[...]                                              # (B, C, HW)
    mean = jnp.mean(x, axis=2, dtype=f32)                       # (B, C) lane reduce

    # Per-block minor-dims transpose in VMEM (XLU) replaces the old host-side
    # HBM transpose of the whole token tensor.
    x_t = jnp.transpose(x, (0, 2, 1))                           # (B, HW, C)
    tok = x_t + pos_tok_ref[...][None, :, :]                    # (B, HW, C)

    # K/V projection of all token rows: one (B*HW, C) x (C, 2C) MXU matmul.
    kv = jnp.dot(tok.reshape(B * HW, C), wkv_ref[...],
                 preferred_element_type=f32) + bkv_ref[...]     # (B*HW, 2C) f32
    k_tok = kv[:, :C].reshape(B, HW, C)
    v_tok = kv[:, C:].reshape(B, HW, C)

    # Mean token (also the query row): small fused QKV matmul.
    mtok = mean + pos_mean_ref[...].astype(f32)                 # (B, C)
    qkv_m = jnp.dot(mtok, wqkv_ref[...].astype(f32),
                    preferred_element_type=f32) + bqkv_ref[...]  # (B, 3C)
    q = qkv_m[:, :C] * scale                                    # (B, C)
    k_m = qkv_m[:, C:2 * C]                                     # (B, C)
    v_m = qkv_m[:, 2 * C:]                                      # (B, C)

    hmask = hmask_ref[...]                                      # (C, nh)
    hmask_t = hmask_t_ref[...]                                  # (nh, C)

    # Per-head scores for all heads at once (head reduction via 0/1 mask matmul).
    e_tok = q[:, None, :] * k_tok                               # (B, HW, C)
    s_tok = jnp.dot(e_tok.reshape(B * HW, C), hmask,
                    preferred_element_type=f32).reshape(B, HW, nh)
    s_m = jnp.dot(q * k_m, hmask, preferred_element_type=f32)   # (B, nh)

    # Softmax over the HW + 1 keys; the mean-token key is a separate 1-row term.
    m = jnp.maximum(jnp.max(s_tok, axis=1), s_m)                # (B, nh)
    p_tok = jnp.exp(s_tok - m[:, None, :])                      # (B, HW, nh)
    p_m = jnp.exp(s_m - m)                                      # (B, nh)
    inv = 1.0 / (jnp.sum(p_tok, axis=1) + p_m)                  # (B, nh)
    p_tok = p_tok * inv[:, None, :]
    p_m = p_m * inv

    # Expand normalized per-head probabilities back to channels, reduce over keys.
    p_tok_c = jnp.dot(p_tok.reshape(B * HW, nh), hmask_t,
                      preferred_element_type=f32).reshape(B, HW, C)
    p_m_c = jnp.dot(p_m, hmask_t, preferred_element_type=f32)   # (B, C)
    attn = jnp.sum(p_tok_c * v_tok, axis=1) + p_m_c * v_m       # (B, C)

    # Output projection computed in transposed form so the store is lane-dense:
    # (out, B) with the batch tile on the 128-lane axis.
    out_t = jnp.dot(wc_ref[...].astype(f32), attn.T,
                    preferred_element_type=f32) + bc_ref[...]   # (out, B)
    o_ref[...] = out_t.astype(o_ref.dtype)


def attention_pool2d(x, params, num_heads, *, batch_tile=None, compute_dtype=None):
    N, C, H, W = x.shape
    HW = H * W
    assert C % num_heads == 0
    head_dim = C // num_heads
    out_dim = params["wc"].shape[0]
    out_dtype = x.dtype
    f32 = jnp.float32

    in_dtype = jnp.dtype(compute_dtype) if compute_dtype is not None else jnp.dtype(x.dtype)
    itemsize = in_dtype.itemsize

    # Batch tile: ~1 MiB token block per grid step, 128-aligned when tiled (so the
    # transposed output block is lane-dense and (8,128)-legal) and >= 2 grid steps
    # when the batch is big enough (keeps both v7x TensorCores busy).
    if batch_tile is None:
        batch_tile = max(1, (1 << 20) // (C * HW * itemsize))
        batch_tile = min(batch_tile, 4096)
        if batch_tile >= N and N >= 256:
            batch_tile = pl.cdiv(pl.cdiv(N, 2), 128) * 128
    batch_tile = max(1, min(batch_tile, N))
    if batch_tile < N:
        batch_tile = max(128, (batch_tile // 128) * 128)
        batch_tile = min(batch_tile, N)
    grid_n = pl.cdiv(N, batch_tile)
    n_pad = grid_n * batch_tile

    # Host-side parameter prep (tiny, done once; no transpose/pad of the big tensor).
    tokens = x.reshape(N, C, HW)                                 # free reshape
    if tokens.dtype != in_dtype:
        tokens = tokens.astype(in_dtype)

    wkv_t = jnp.concatenate([params["wk"].T, params["wv"].T], axis=1).astype(in_dtype)
    bkv = jnp.concatenate([params["bk"], params["bv"]]).reshape(1, 2 * C).astype(f32)
    wqkv_t = jnp.concatenate(
        [params["wq"].T, params["wk"].T, params["wv"].T], axis=1).astype(in_dtype)
    bqkv = jnp.concatenate(
        [params["bq"], params["bk"], params["bv"]]).reshape(1, 3 * C).astype(f32)
    wc = params["wc"].astype(in_dtype)                           # (out, C), original layout
    bc_col = params["bc"].reshape(out_dim, 1).astype(f32)
    pos_mean = params["pos"][0:1, :].astype(f32)
    pos_tok = params["pos"][1:, :].astype(in_dtype)

    head_of_c = jnp.arange(C, dtype=jnp.int32) // head_dim
    hmask = (head_of_c[:, None] ==
             jnp.arange(num_heads, dtype=jnp.int32)[None, :]).astype(f32)   # (C, nh)
    hmask_t = hmask.T                                                        # (nh, C)

    kernel = functools.partial(_attn_pool_kernel,
                               num_heads=num_heads, head_dim=head_dim)

    const = lambda n: (0, 0)
    grid_spec = pltpu.PrefetchScalarGridSpec(
        num_scalar_prefetch=0,
        grid=(grid_n,),
        in_specs=[
            pl.BlockSpec((batch_tile, C, HW), lambda n: (n, 0, 0)),  # tokens (NCHW)
            pl.BlockSpec((HW, C), const),               # pos rows 1..HW
            pl.BlockSpec((1, C), const),                # pos row 0
            pl.BlockSpec((C, 2 * C), const),            # [Wk|Wv]^T
            pl.BlockSpec((1, 2 * C), const),            # [bk|bv]
            pl.BlockSpec((C, 3 * C), const),            # [Wq|Wk|Wv]^T
            pl.BlockSpec((1, 3 * C), const),            # [bq|bk|bv]
            pl.BlockSpec((C, num_heads), const),        # head mask
            pl.BlockSpec((num_heads, C), const),        # head mask, transposed
            pl.BlockSpec((out_dim, C), const),          # Wc
            pl.BlockSpec((out_dim, 1), const),          # bc (column)
        ],
        out_specs=pl.BlockSpec((out_dim, batch_tile), lambda n: (0, n)),
    )

    flops = (2 * N * HW * C * 2 * C            # token K/V projection
             + 2 * N * C * 3 * C               # mean-token QKV projection
             + 4 * N * HW * C * num_heads      # head-mask score/expand matmuls
             + 6 * N * HW * C                  # elementwise score/value work
             + 2 * N * C * out_dim)            # output projection
    bytes_accessed = (N * C * HW * itemsize
                      + out_dim * n_pad * jnp.dtype(out_dtype).itemsize
                      + (5 * C * C + C * out_dim + (HW + 1) * C) * itemsize
                      + (5 * C + out_dim + 2 * num_heads * C) * 4)
    cost = pl.CostEstimate(flops=int(flops),
                           transcendentals=int(N * (HW + 1) * num_heads),
                           bytes_accessed=int(bytes_accessed))

    out_t = pl.pallas_call(
        kernel,
        out_shape=jax.ShapeDtypeStruct((out_dim, n_pad), out_dtype),
        grid_spec=grid_spec,
        compiler_params=pltpu.CompilerParams(
            dimension_semantics=("parallel",),
            vmem_limit_bytes=48 * 1024 * 1024),
        cost_estimate=cost,
    )(tokens, pos_tok, pos_mean, wkv_t, bkv, wqkv_t, bqkv, hmask, hmask_t,
      wc, bc_col)

    return out_t[:, :N].T                                        # (N, out_dim)


def init_params(key, embed_dim, group_dim, output_dim):
    ks = jax.random.split(key, 9)
    pos = (jax.random.normal(ks[0], (embed_dim + 1, group_dim), jnp.float32)
           / embed_dim ** 0.5)

    def linear(kw, kb, out_f, in_f):
        bound = 1.0 / math.sqrt(in_f)
        w = jax.random.uniform(kw, (out_f, in_f), jnp.float32, -bound, bound)
        b = jax.random.uniform(kb, (out_f,), jnp.float32, -bound, bound)
        return w, b

    wq, bq = linear(ks[1], ks[2], group_dim, group_dim)
    wk, bk = linear(ks[3], ks[4], group_dim, group_dim)
    wv, bv = linear(ks[5], ks[6], group_dim, group_dim)
    wc, bc = linear(ks[7], ks[8], output_dim, group_dim)
    return dict(pos=pos, wq=wq, bq=bq, wk=wk, bk=bk, wv=wv, bv=bv, wc=wc, bc=bc)


def reference_forward(x, params, num_heads):
    # Pure-JAX port of the PyTorch forward (multi_head_attention_forward path).
    N, C, H, W = x.shape
    hd = C // num_heads
    mm = functools.partial(jnp.matmul, precision=jax.lax.Precision.HIGHEST)
    t = jnp.transpose(x.reshape(N, C, H * W), (2, 0, 1))             # (HW, N, C)
    t = jnp.concatenate([t.mean(axis=0, keepdims=True), t], axis=0)  # (L, N, C)
    t = t + params["pos"][:, None, :]
    L = t.shape[0]
    q = (mm(t[:1], params["wq"].T) + params["bq"]) * (hd ** -0.5)
    k = mm(t, params["wk"].T) + params["bk"]
    v = mm(t, params["wv"].T) + params["bv"]
    qh = q.reshape(1, N * num_heads, hd).transpose(1, 0, 2)
    kh = k.reshape(L, N * num_heads, hd).transpose(1, 0, 2)
    vh = v.reshape(L, N * num_heads, hd).transpose(1, 0, 2)
    scores = mm(qh, kh.transpose(0, 2, 1))                           # (N*H, 1, L)
    p = jax.nn.softmax(scores, axis=-1)
    o = mm(p, vh).transpose(1, 0, 2).reshape(1, N, C)
    out = mm(o, params["wc"].T) + params["bc"]
    return out[0]                                                    # (N, out_dim)


if __name__ == "__main__":
    # embed_dim = H*W = 16, group_dim = C = 32, num_heads = 4, output_dim = 32
    num_heads = 4
    output_dim = 32
    C, H, W = 32, 4, 4
    embed_dim = H * W

    key = jax.random.PRNGKey(0)
    kx, kp, kx2 = jax.random.split(key, 3)
    params = init_params(kp, embed_dim, C, output_dim)

    # Small single-block case.
    N = 2
    x = jax.random.normal(kx, (N, C, H, W), jnp.float32)
    out = jax.block_until_ready(attention_pool2d(x, params, num_heads))
    ref = reference_forward(x, params, num_heads)
    assert out.shape == (N, output_dim), out.shape
    max_diff = float(jnp.max(jnp.abs(out - ref)))
    assert jnp.allclose(out, ref, atol=2e-3, rtol=2e-3), f"max abs diff {max_diff}"

    # Multi-block case with a ragged tail (exercises the tiled, boundary-block,
    # lane-dense-store path: batch_tile=256, grid_n=2, last block partially valid).
    N2 = 300
    x2 = jax.random.normal(kx2, (N2, C, H, W), jnp.float32)
    out2 = jax.block_until_ready(attention_pool2d(x2, params, num_heads))
    ref2 = reference_forward(x2, params, num_heads)
    assert out2.shape == (N2, output_dim), out2.shape
    max_diff2 = float(jnp.max(jnp.abs(out2 - ref2)))
    assert jnp.allclose(out2, ref2, atol=2e-3, rtol=2e-3), f"max abs diff {max_diff2}"

    print("KERNEL_OK")
</pallas_src>

<mosaic_0001>
module attributes {stable_mosaic.version = 11 : i64} {
  func.func @_attn_pool_kernel(%arg0: i32, %arg1: memref<2x32x16xf32, #tpu.memory_space<vmem>>, %arg2: memref<16x32xf32, #tpu.memory_space<vmem>>, %arg3: memref<1x32xf32, #tpu.memory_space<vmem>>, %arg4: memref<32x64xf32, #tpu.memory_space<vmem>>, %arg5: memref<1x64xf32, #tpu.memory_space<vmem>>, %arg6: memref<32x96xf32, #tpu.memory_space<vmem>>, %arg7: memref<1x96xf32, #tpu.memory_space<vmem>>, %arg8: memref<32x4xf32, #tpu.memory_space<vmem>>, %arg9: memref<4x32xf32, #tpu.memory_space<vmem>>, %arg10: memref<32x32xf32, #tpu.memory_space<vmem>>, %arg11: memref<32x1xf32, #tpu.memory_space<vmem>>, %arg12: memref<32x2xf32, #tpu.memory_space<vmem>>) attributes {dimension_semantics = [#tpu.dimension_semantics<parallel>], iteration_bounds = array<i64: 1>, scalar_prefetch = 0 : i64, scratch_operands = 0 : i64, tpu.core_type = #tpu.core_type<tc>, window_params = [{transform_indices = @transform_0, window_bounds = array<i64: 2, 32, 16>}, {pipeline_mode = #tpu.pipeline_mode<synchronous>, transform_indices = @transform_1, window_bounds = array<i64: 16, 32>}, {pipeline_mode = #tpu.pipeline_mode<synchronous>, transform_indices = @transform_2, window_bounds = array<i64: 1, 32>}, {pipeline_mode = #tpu.pipeline_mode<synchronous>, transform_indices = @transform_3, window_bounds = array<i64: 32, 64>}, {pipeline_mode = #tpu.pipeline_mode<synchronous>, transform_indices = @transform_4, window_bounds = array<i64: 1, 64>}, {pipeline_mode = #tpu.pipeline_mode<synchronous>, transform_indices = @transform_5, window_bounds = array<i64: 32, 96>}, {pipeline_mode = #tpu.pipeline_mode<synchronous>, transform_indices = @transform_6, window_bounds = array<i64: 1, 96>}, {pipeline_mode = #tpu.pipeline_mode<synchronous>, transform_indices = @transform_7, window_bounds = array<i64: 32, 4>}, {pipeline_mode = #tpu.pipeline_mode<synchronous>, transform_indices = @transform_8, window_bounds = array<i64: 4, 32>}, {pipeline_mode = #tpu.pipeline_mode<synchronous>, transform_indices = @transform_9, window_bounds = array<i64: 32, 32>}, {pipeline_mode = #tpu.pipeline_mode<synchronous>, transform_indices = @transform_10, window_bounds = array<i64: 32, 1>}, {transform_indices = @transform_11, window_bounds = array<i64: 32, 2>}]} {
    %c0 = arith.constant 0 : index
    %c0_0 = arith.constant 0 : index
    %c0_1 = arith.constant 0 : index
    %0 = vector.load %arg1[%c0, %c0_0, %c0_1] : memref<2x32x16xf32, #tpu.memory_space<vmem>>, vector<2x32x16xf32>
    %cst = arith.constant dense<0.000000e+00> : vector<2x32xf32>
    %1 = vector.multi_reduction <add>, %0, %cst [2] : vector<2x32x16xf32> to vector<2x32xf32>
    %cst_2 = arith.constant 1.600000e+01 : f32
    %2 = vector.broadcast %cst_2 : f32 to vector<2x32xf32>
    %3 = arith.divf %1, %2 : vector<2x32xf32>
    %4 = tpu.transpose %0, [0, 2, 1] : vector<2x32x16xf32> -> vector<2x16x32xf32>
    %c0_3 = arith.constant 0 : index
    %c0_4 = arith.constant 0 : index
    %5 = vector.load %arg2[%c0_3, %c0_4] : memref<16x32xf32, #tpu.memory_space<vmem>>, vector<16x32xf32>
    %6 = vector.shape_cast %5 : vector<16x32xf32> to vector<1x16x32xf32>
    %7 = vector.broadcast %6 : vector<1x16x32xf32> to vector<2x16x32xf32>
    %8 = arith.addf %4, %7 : vector<2x16x32xf32>
    %9 = vector.shape_cast %8 : vector<2x16x32xf32> to vector<32x32xf32>
    %c0_5 = arith.constant 0 : index
    %c0_6 = arith.constant 0 : index
    %10 = vector.load %arg4[%c0_5, %c0_6] : memref<32x64xf32, #tpu.memory_space<vmem>>, vector<32x64xf32>
    %cst_7 = arith.constant dense<0.000000e+00> : vector<32x64xf32>
    %11 = tpu.matmul %9, %10, %cst_7 {dimension_numbers = #tpu.dot_dimension_numbers<[1], [0], [0], [1], [0, 0, 1, 1], [], []>} : vector<32x32xf32>, vector<32x64xf32>, vector<32x64xf32> -> vector<32x64xf32>
    %c0_8 = arith.constant 0 : index
    %c0_9 = arith.constant 0 : index
    %12 = vector.load %arg5[%c0_8, %c0_9] : memref<1x64xf32, #tpu.memory_space<vmem>>, vector<1x64xf32>
    %13 = vector.broadcast %12 : vector<1x64xf32> to vector<32x64xf32>
    %14 = arith.addf %11, %13 : vector<32x64xf32>
    %15 = vector.extract_strided_slice %14 {offsets = [0, 0], sizes = [32, 32], strides = [1, 1]} : vector<32x64xf32> to vector<32x32xf32>
    %16 = vector.shape_cast %15 : vector<32x32xf32> to vector<2x16x32xf32>
    %17 = vector.extract_strided_slice %14 {offsets = [0, 32], sizes = [32, 32], strides = [1, 1]} : vector<32x64xf32> to vector<32x32xf32>
    %18 = vector.shape_cast %17 : vector<32x32xf32> to vector<2x16x32xf32>
    %c0_10 = arith.constant 0 : index
    %c0_11 = arith.constant 0 : index
    %19 = vector.load %arg3[%c0_10, %c0_11] : memref<1x32xf32, #tpu.memory_space<vmem>>, vector<1x32xf32>
    %20 = vector.broadcast %19 : vector<1x32xf32> to vector<2x32xf32>
    %21 = arith.addf %3, %20 : vector<2x32xf32>
    %c0_12 = arith.constant 0 : index
    %c0_13 = arith.constant 0 : index
    %22 = vector.load %arg6[%c0_12, %c0_13] : memref<32x96xf32, #tpu.memory_space<vmem>>, vector<32x96xf32>
    %cst_14 = arith.constant dense<0.000000e+00> : vector<2x96xf32>
    %23 = tpu.matmul %21, %22, %cst_14 {dimension_numbers = #tpu.dot_dimension_numbers<[1], [0], [0], [1], [0, 0, 1, 1], [], []>} : vector<2x32xf32>, vector<32x96xf32>, vector<2x96xf32> -> vector<2x96xf32>
    %c0_15 = arith.constant 0 : index
    %c0_16 = arith.constant 0 : index
    %24 = vector.load %arg7[%c0_15, %c0_16] : memref<1x96xf32, #tpu.memory_space<vmem>>, vector<1x96xf32>
    %25 = vector.broadcast %24 : vector<1x96xf32> to vector<2x96xf32>
    %26 = arith.addf %23, %25 : vector<2x96xf32>
    %27 = vector.extract_strided_slice %26 {offsets = [0, 0], sizes = [2, 32], strides = [1, 1]} : vector<2x96xf32> to vector<2x32xf32>
    %cst_17 = arith.constant 0.353553385 : f32
    %28 = vector.broadcast %cst_17 : f32 to vector<2x32xf32>
    %29 = arith.mulf %27, %28 : vector<2x32xf32>
    %30 = vector.extract_strided_slice %26 {offsets = [0, 32], sizes = [2, 32], strides = [1, 1]} : vector<2x96xf32> to vector<2x32xf32>
    %31 = vector.extract_strided_slice %26 {offsets = [0, 64], sizes = [2, 32], strides = [1, 1]} : vector<2x96xf32> to vector<2x32xf32>
    %c0_18 = arith.constant 0 : index
    %c0_19 = arith.constant 0 : index
    %32 = vector.load %arg8[%c0_18, %c0_19] : memref<32x4xf32, #tpu.memory_space<vmem>>, vector<32x4xf32>
    %c0_20 = arith.constant 0 : index
    %c0_21 = arith.constant 0 : index
    %33 = vector.load %arg9[%c0_20, %c0_21] : memref<4x32xf32, #tpu.memory_space<vmem>>, vector<4x32xf32>
    %34 = vector.shape_cast %29 : vector<2x32xf32> to vector<2x1x32xf32>
    %35 = vector.broadcast %34 : vector<2x1x32xf32> to vector<2x16x32xf32>
    %36 = arith.mulf %35, %16 : vector<2x16x32xf32>
    %37 = vector.shape_cast %36 : vector<2x16x32xf32> to vector<32x32xf32>
    %cst_22 = arith.constant dense<0.000000e+00> : vector<32x4xf32>
    %38 = tpu.matmul %37, %32, %cst_22 {dimension_numbers = #tpu.dot_dimension_numbers<[1], [0], [0], [1], [0, 0, 1, 1], [], []>} : vector<32x32xf32>, vector<32x4xf32>, vector<32x4xf32> -> vector<32x4xf32>
    %39 = vector.shape_cast %38 : vector<32x4xf32> to vector<2x16x4xf32>
    %40 = arith.mulf %29, %30 : vector<2x32xf32>
    %cst_23 = arith.constant dense<0.000000e+00> : vector<2x4xf32>
    %41 = tpu.matmul %40, %32, %cst_23 {dimension_numbers = #tpu.dot_dimension_numbers<[1], [0], [0], [1], [0, 0, 1, 1], [], []>} : vector<2x32xf32>, vector<32x4xf32>, vector<2x4xf32> -> vector<2x4xf32>
    %cst_24 = arith.constant dense<0xFF800000> : vector<2x4xf32>
    %42 = vector.multi_reduction <maximumf>, %39, %cst_24 [1] : vector<2x16x4xf32> to vector<2x4xf32>
    %43 = arith.maximumf %42, %41 : vector<2x4xf32>
    %44 = vector.shape_cast %43 : vector<2x4xf32> to vector<2x1x4xf32>
    %45 = vector.broadcast %44 : vector<2x1x4xf32> to vector<2x16x4xf32>
    %46 = arith.subf %39, %45 : vector<2x16x4xf32>
    %47 = math.exp %46 : vector<2x16x4xf32>
    %48 = arith.subf %41, %43 : vector<2x4xf32>
    %49 = math.exp %48 : vector<2x4xf32>
    %cst_25 = arith.constant dense<0.000000e+00> : vector<2x4xf32>
    %50 = vector.multi_reduction <add>, %47, %cst_25 [1] : vector<2x16x4xf32> to vector<2x4xf32>
    %51 = arith.addf %50, %49 : vector<2x4xf32>
    %cst_26 = arith.constant 1.000000e+00 : f32
    %52 = vector.broadcast %cst_26 : f32 to vector<2x4xf32>
    %53 = arith.divf %52, %51 : vector<2x4xf32>
    %54 = vector.shape_cast %53 : vector<2x4xf32> to vector<2x1x4xf32>
    %55 = vector.broadcast %54 : vector<2x1x4xf32> to vector<2x16x4xf32>
    %56 = arith.mulf %47, %55 : vector<2x16x4xf32>
    %57 = arith.mulf %49, %53 : vector<2x4xf32>
    %58 = vector.shape_cast %56 : vector<2x16x4xf32> to vector<32x4xf32>
    %cst_27 = arith.constant dense<0.000000e+00> : vector<32x32xf32>
    %59 = tpu.matmul %58, %33, %cst_27 {dimension_numbers = #tpu.dot_dimension_numbers<[1], [0], [0], [1], [0, 0, 1, 1], [], []>} : vector<32x4xf32>, vector<4x32xf32>, vector<32x32xf32> -> vector<32x32xf32>
    %60 = vector.shape_cast %59 : vector<32x32xf32> to vector<2x16x32xf32>
    %cst_28 = arith.constant dense<0.000000e+00> : vector<2x32xf32>
    %61 = tpu.matmul %57, %33, %cst_28 {dimension_numbers = #tpu.dot_dimension_numbers<[1], [0], [0], [1], [0, 0, 1, 1], [], []>} : vector<2x4xf32>, vector<4x32xf32>, vector<2x32xf32> -> vector<2x32xf32>
    %62 = arith.mulf %60, %18 : vector<2x16x32xf32>
    %cst_29 = arith.constant dense<0.000000e+00> : vector<2x32xf32>
    %63 = vector.multi_reduction <add>, %62, %cst_29 [1] : vector<2x16x32xf32> to vector<2x32xf32>
    %64 = arith.mulf %61, %31 : vector<2x32xf32>
    %65 = arith.addf %63, %64 : vector<2x32xf32>
    %c0_30 = arith.constant 0 : index
    %c0_31 = arith.constant 0 : index
    %66 = vector.load %arg10[%c0_30, %c0_31] : memref<32x32xf32, #tpu.memory_space<vmem>>, vector<32x32xf32>
    %67 = tpu.transpose %65, [1, 0] : vector<2x32xf32> -> vector<32x2xf32>
    %cst_32 = arith.constant dense<0.000000e+00> : vector<32x2xf32>
    %68 = tpu.matmul %66, %67, %cst_32 {dimension_numbers = #tpu.dot_dimension_numbers<[1], [0], [0], [1], [0, 0, 1, 1], [], []>} : vector<32x32xf32>, vector<32x2xf32>, vector<32x2xf32> -> vector<32x2xf32>
    %c0_33 = arith.constant 0 : index
    %c0_34 = arith.constant 0 : index
    %69 = vector.load %arg11[%c0_33, %c0_34] : memref<32x1xf32, #tpu.memory_space<vmem>>, vector<32x1xf32>
    %70 = vector.broadcast %69 : vector<32x1xf32> to vector<32x2xf32>
    %71 = arith.addf %68, %70 : vector<32x2xf32>
    %c0_35 = arith.constant 0 : index
    %c0_36 = arith.constant 0 : index
    %72 = vector.load %arg12[%c0_35, %c0_36] : memref<32x2xf32, #tpu.memory_space<vmem>>, vector<32x2xf32>
    tpu.vector_store %arg12[%c0_35, %c0_36], %71 {strides = array<i32>} : memref<32x2xf32, #tpu.memory_space<vmem>>, vector<32x2xf32>,
    return
  }
  func.func @transform_0(%arg0: i32) -> (i32, i32, i32) {
    %c0_i32 = arith.constant 0 : i32
    %c0_i32_0 = arith.constant 0 : i32
    %c0_i32_1 = arith.constant 0 : i32
    return %arg0, %c0_i32, %c0_i32_0 : i32, i32, i32
  }
  func.func @transform_1(%arg0: i32) -> (i32, i32) {
    %c0_i32 = arith.constant 0 : i32
    %c0_i32_0 = arith.constant 0 : i32
    %c0_i32_1 = arith.constant 0 : i32
    return %c0_i32, %c0_i32_0 : i32, i32
  }
  func.func @transform_2(%arg0: i32) -> (i32, i32) {
    %c0_i32 = arith.constant 0 : i32
    %c0_i32_0 = arith.constant 0 : i32
    %c0_i32_1 = arith.constant 0 : i32
    return %c0_i32, %c0_i32_0 : i32, i32
  }
  func.func @transform_3(%arg0: i32) -> (i32, i32) {
    %c0_i32 = arith.constant 0 : i32
    %c0_i32_0 = arith.constant 0 : i32
    %c0_i32_1 = arith.constant 0 : i32
    return %c0_i32, %c0_i32_0 : i32, i32
  }
  func.func @transform_4(%arg0: i32) -> (i32, i32) {
    %c0_i32 = arith.constant 0 : i32
    %c0_i32_0 = arith.constant 0 : i32
    %c0_i32_1 = arith.constant 0 : i32
    return %c0_i32, %c0_i32_0 : i32, i32
  }
  func.func @transform_5(%arg0: i32) -> (i32, i32) {
    %c0_i32 = arith.constant 0 : i32
    %c0_i32_0 = arith.constant 0 : i32
    %c0_i32_1 = arith.constant 0 : i32
    return %c0_i32, %c0_i32_0 : i32, i32
  }
  func.func @transform_6(%arg0: i32) -> (i32, i32) {
    %c0_i32 = arith.constant 0 : i32
    %c0_i32_0 = arith.constant 0 : i32
    %c0_i32_1 = arith.constant 0 : i32
    return %c0_i32, %c0_i32_0 : i32, i32
  }
  func.func @transform_7(%arg0: i32) -> (i32, i32) {
    %c0_i32 = arith.constant 0 : i32
    %c0_i32_0 = arith.constant 0 : i32
    %c0_i32_1 = arith.constant 0 : i32
    return %c0_i32, %c0_i32_0 : i32, i32
  }
  func.func @transform_8(%arg0: i32) -> (i32, i32) {
    %c0_i32 = arith.constant 0 : i32
    %c0_i32_0 = arith.constant 0 : i32
    %c0_i32_1 = arith.constant 0 : i32
    return %c0_i32, %c0_i32_0 : i32, i32
  }
  func.func @transform_9(%arg0: i32) -> (i32, i32) {
    %c0_i32 = arith.constant 0 : i32
    %c0_i32_0 = arith.constant 0 : i32
    %c0_i32_1 = arith.constant 0 : i32
    return %c0_i32, %c0_i32_0 : i32, i32
  }
  func.func @transform_10(%arg0: i32) -> (i32, i32) {
    %c0_i32 = arith.constant 0 : i32
    %c0_i32_0 = arith.constant 0 : i32
    %c0_i32_1 = arith.constant 0 : i32
    return %c0_i32, %c0_i32_0 : i32, i32
  }
  func.func @transform_11(%arg0: i32) -> (i32, i32) {
    %c0_i32 = arith.constant 0 : i32
    %c0_i32_0 = arith.constant 0 : i32
    return %c0_i32, %arg0 : i32, i32
  }
}

</mosaic_0001>

<bundles_post_ra>
// kernel: tpu_custom_call.1
= control target key start
LH: loop header
LB: loop body
LE: loop exit
PB: predicated region body
PF: predicated region fallthrough
CT: control target
= control target key end

     0   :  { %vm46_vm0 = vcmask 130048   ;;  %v209_v0 = vlaneseq  ;;  %v782_v22 = vmov 16.0   ;;  %v783_v23 = vmov 0   ;;  %s784_s20 = smov 96   ;;  %s1051_s0 = inlined_call_operand.vmem [shape: f32[2,32,16], index: 0, kind: input, shape index: {}]   ;;  %s1052_s2 = inlined_call_operand.vmem [shape: f32[1,32], index: 2, kind: input, shape index: {}]   ;;  %s1053_s5 = inlined_call_operand.vmem [shape: f32[32,96], index: 5, kind: input, shape index: {}]   ;;  %s1054_s6 = inlined_call_operand.vmem [shape: f32[1,96], index: 6, kind: input, shape index: {}]   ;;  %s1055_s3 = inlined_call_operand.vmem [shape: f32[32,64], index: 3, kind: input, shape index: {}]   ;;  %s1056_s10 = inlined_call_operand.vmem [shape: f32[32,1], index: 10, kind: input, shape index: {}]   ;;  %s1057_s1 = inlined_call_operand.vmem [shape: f32[16,32], index: 1, kind: input, shape index: {}]   ;;  %s1058_s4 = inlined_call_operand.vmem [shape: f32[1,64], index: 4, kind: input, shape index: {}]   ;;  %s1059_s7 = inlined_call_operand.vmem [shape: f32[32,4], index: 7, kind: input, shape index: {}]   ;;  %s1060_s8 = inlined_call_operand.vmem [shape: f32[4,32], index: 8, kind: input, shape index: {}]   ;;  %s1061_s9 = inlined_call_operand.vmem [shape: f32[32,32], index: 9, kind: input, shape index: {}]   ;;  %s1062_s11 = inlined_call_operand.vmem [shape: f32[32,2], index: 11, kind: output, shape index: {}]  }
   0x1   :  { %v849_v1 = vld [vmem:[%s1051_s0 + $0x20] sm:$0xff]  ;;  %v854_v2 = vld [vmem:[%s1051_s0 + $0x10] sm:$0xff]  ;;  %v871_v8 = vld [vmem:[%s1051_s0 + $0x28] sm:$0xff]  ;;  %766 = vrcp.f32 %v782_v22  ;;  %vm290_vm2 = vcmask 130112   ;;  %vm294_vm3 = vcmask 195712   ;;  %vm298_vm4 = vcmask 261312  }
   0x2   :  { %v859_v3 = vld [vmem:[%s1051_s0] sm:$0xff]  ;;  %v59_v4 = vsel %vm46_vm0, %v849_v1, 0.0  ;;  %v53_v5 = vsel %vm46_vm0, %v854_v2, 0.0  ;;  %v210_v7 = vshrl.u32 %v209_v0, 7  ;;  %v876_v9 = vld [vmem:[%s1051_s0 + $0x30] sm:$0xff]  ;;  %v881_v12 = vld [vmem:[%s1051_s0 + $0x8] sm:$0xff] }
   0x3   :  { %v47_v6 = vsel %vm46_vm0, %v859_v3, 0.0  ;;  %60 = vadd.xlane.f32.xlu1 %v59_v4  ;;  %54 = vadd.xlane.f32.xlu2 %v53_v5  ;;  %v62_v13 = vsel %vm46_vm0, %v871_v8, 0.0  ;;  %v65_v14 = vsel %vm46_vm0, %v876_v9, 0.0  ;;  %v50_v15 = vsel %vm46_vm0, %v881_v12, 0.0  ;;  %v892_v16 = vld [vmem:[%s1051_s0 + $0x38] sm:$0xff]  ;;  %v247_v59 = vld [vmem:[%s1053_s5 + $0x10] sm:$0xff] }
   0x4   :  { %48 = vadd.xlane.f32.xlu0 %v47_v6  ;;  %756 = vset.pattern.permute.xlu2 %v210_v7  ;;  %v217_v10 = vadd.s32 8, %v210_v7  ;;  %v223_v11 = vadd.s32 16, %v210_v7  ;;  %v897_v17 = vld [vmem:[%s1051_s0 + $0x18] sm:$0xff]  ;;  %v68_v18 = vsel %vm46_vm0, %v892_v16, 0.0  ;;  %v763_v20 = vld [vmem:[%s1052_s2] ss:$0 sm:$0xff] }
   0x5   :  { %v56_v19 = vsel %vm46_vm0, %v897_v17, 0.0  ;;  %v229_v21 = vadd.s32 24, %v210_v7  ;;  %v248_v58 = vld [vmem:[%s1053_s5 + $0x18] sm:$0xff]  ;;  %v246_v60 = vld [vmem:[%s1053_s5 + $0x8] sm:$0xff]  ;;  %v245_v61 = vld [vmem:[%s1053_s5] sm:$0xff]  ;;  %vm307_vm5 = vcmask 1041409  }
   0x6   :  { %757 = vset.pattern.permute.xlu0 %v217_v10  ;;  %758 = vset.pattern.permute.xlu1 %v223_v11  ;;  %vm164_vm6 = vcmask 261120   ;;  %vm416_vm7 = vcmask 31744   ;;  %vm541_vm8 = vcmask 1043456  }
   0x7   :  { %v767_v24 = vpop.eup %766  ;;  %323 = vmatpush.msra.mxu1 %v248_v58 }
   0x8   :  { %v72_v25 = vmul.f32 16.0, %v767_v24  ;;  %vm76_vm1 = vweird.f32 %v767_v24 }
   0x9   :  { %324 = vmatpush.msra.mxu1 %v247_v59 }
   0xa   :  { %v73_v26 = vsub.f32 1.0, %v72_v25  ;;  %v159_v25 = vld [vmem:[%s1055_s3 + $0x18] sm:$0xff] }
   0xb   :  { %63 = vadd.xlane.f32.xlu1 %v62_v13  ;;  %66 = vadd.xlane.f32.xlu2 %v65_v14 }
   0xc   :  { %51 = vadd.xlane.f32.xlu0 %v50_v15  ;;  %v74_v28 = vmul.f32 %v767_v24, %v73_v26  ;;  %325 = vmatpush.msra.mxu1 %v246_v60  ;;  %v158_v26 = vld [vmem:[%s1055_s3 + $0x10] sm:$0xff] }
   0xd   :  { %189 = vmatpush.msra.mxu0 %v159_v25 }
   0xe   :  { %v75_v29 = vadd.f32 %v767_v24, %v74_v28  ;;  %326 = vmatpush.msra.mxu1 %v245_v61  ;;  %v651_v28 = vld [vmem:[%s1056_s10 + $0x10] sm:$0xff] }
   0xf   :  { %190 = vmatpush.msra.mxu0 %v158_v26 }
  0x10   :  { %v77_v33 = vsel %vm76_vm1, %v767_v24, %v75_v29  ;;  %v156_v29 = vld [vmem:[%s1055_s3] sm:$0xff]  ;;  %vm720_vm1 = vcmask 15360  }
  0x13   :  { %69 = vadd.xlane.f32.xlu1 %v68_v18 }
  0x14   :  { %57 = vadd.xlane.f32.xlu0 %v56_v19 }
  0x23   :  { %213 = vperm.xlu2 %756, %v763_v20  }
  0x28   :  { %219 = vperm.xlu0 %757, %v763_v20  }
  0x2b   :  { %759 = vset.pattern.permute.xlu2 %v229_v21 }
  0x2c   :  { %225 = vperm.xlu1 %758, %v763_v20  }
  0x30   :  { %762 = vset.pattern.permute.xlu0 %v783_v23 }
  0x33   :  { %231 = vperm.xlu2 %759, %v763_v20  }
  0x34   :  { %761 = vset.pattern.permute.xlu1 %v783_v23 }
  0x3b   :  { %760 = vset.pattern.permute.xlu2 %v783_v23 }
  0x76   :  { %v55_v27 = vpop.xlane.xlu2 %54  ;;  %v61_v32 = vpop.xlane.xlu1 %60 }
  0x77   :  { %v49_v30 = vpop.xlane.xlu0 %48  ;;  %v82_v38 = vmul.f32 %v77_v33, %v61_v32  ;;  %v80_v46 = vmul.f32 %v77_v33, %v55_v27  ;;  %v157_v27 = vld [vmem:[%s1055_s3 + $0x8] sm:$0xff] }
  0x78   :  { %v78_v34 = vmul.f32 %v77_v33, %v49_v30  ;;  %191 = vmatpush.msra.mxu0 %v157_v27  ;;  %v150_v30 = vld [vmem:[%s1057_s1] sm:$0xff] }
  0x7a   :  { %192 = vmatpush.msra.mxu0 %v156_v29 }
  0x7e   :  { %v67_v31 = vpop.xlane.xlu2 %66  ;;  %v64_v39 = vpop.xlane.xlu1 %63 }
  0x7f   :  { %v52_v37 = vpop.xlane.xlu0 %51  ;;  %v84_v47 = vmul.f32 %v77_v33, %v67_v31  ;;  %v83_v49 = vmul.f32 %v77_v33, %v64_v39  ;;  %v335_v39 = vld [vmem:[%s1059_s7 + $0x18] sm:$0xff] }
  0x80   :  { %v79_v43 = vmul.f32 %v77_v33, %v52_v37  ;;  %408 = vmatpush.msrb.mxu0 %v335_v39  ;;  %371 = vmatpush.msra.mxu2 %v335_v39 }
  0x86   :  { %v214_v35 = vpop.permute.xlu2 %213  ;;  %v70_v42 = vpop.xlane.xlu1 %69 }
  0x87   :  { %v237_v36 = vadd.f32 %v214_v35, %v78_v34  ;;  %v241_v40 = vadd.f32 %v214_v35, %v82_v38  ;;  %v58_v41 = vpop.xlane.xlu0 %57  ;;  %v85_v52 = vmul.f32 %v77_v33, %v70_v42  ;;  %v333_v42 = vld [vmem:[%s1059_s7 + $0x8] sm:$0xff] }
  0x88   :  { %v81_v56 = vmul.f32 %v77_v33, %v58_v41  ;;  %v151_v33 = vld [vmem:[%s1057_s1 + $0x8] sm:$0xff] }
  0x89   :  { %262 = vperm.xlu2 %760, %v237_v36  }
  0x8e   :  { %v232_v54 = vpop.permute.xlu2 %231 }
  0x8f   :  { %v244_v55 = vadd.f32 %v232_v54, %v85_v52  ;;  %v240_v57 = vadd.f32 %v232_v54, %v81_v56 }
  0x91   :  { %274 = vperm.xlu2 %760, %v241_v40   ;;  %v334_v40 = vld [vmem:[%s1059_s7 + $0x10] sm:$0xff] }
  0x92   :  { %409 = vmatpush.msrb.mxu0 %v334_v40  ;;  %372 = vmatpush.msra.mxu2 %v334_v40 }
  0x94   :  { %410 = vmatpush.msrb.mxu0 %v333_v42  ;;  %373 = vmatpush.msra.mxu2 %v333_v42 }
  0x9a   :  { %v220_v44 = vpop.permute.xlu0 %219 }
  0x9b   :  { %v238_v45 = vadd.f32 %v220_v44, %v79_v43  ;;  %v242_v53 = vadd.f32 %v220_v44, %v83_v49  ;;  %v764_v43 = vld [vmem:[%s1054_s6] ss:$0 sm:$0xff] }
  0x9d   :  { %265 = vperm.xlu1 %761, %v238_v45  }
  0x9e   :  { %v226_v48 = vpop.permute.xlu1 %225 }
  0x9f   :  { %v239_v50 = vadd.f32 %v226_v48, %v80_v46  ;;  %v243_v51 = vadd.f32 %v226_v48, %v84_v47  ;;  %v332_v46 = vld [vmem:[%s1059_s7] sm:$0xff] }
  0xa0   :  { %411 = vmatpush.msrb.mxu0 %v332_v46  ;;  %374 = vmatpush.msra.mxu2 %v332_v46 }
  0xa1   :  { %268 = vperm.xlu0 %762, %v239_v50   ;;  %280 = vperm.xlu2 %760, %v243_v51   ;;  %v765_v50 = vld [vmem:[%s1058_s4] ss:$0 sm:$0xff]  ;;  %s785_s4 = smov 64  }
  0xa5   :  { %277 = vperm.xlu1 %761, %v242_v53  }
  0xa9   :  { %283 = vperm.xlu2 %760, %v244_v55  }
  0xad   :  { %271 = vperm.xlu1 %761, %v240_v57  }
  0xc3   :  { %118 = vxpose.xlu0.b32.start [1/4] (short) (narrow) %v849_v1, 16 }
  0xcb   :  { %119 = vxpose.xlu0.b32.cont [2/4] (short) (narrow) %v871_v8, 16 }
  0xd3   :  { %120 = vxpose.xlu0.b32.cont [3/4] (short) (narrow) %v876_v9, 16 }
  0xdb   :  { %121 = vxpose.xlu0.b32.end [4/4] (short) (narrow) %v892_v16, 16 }
  0xe2   :  { %86 = vxpose.xlu1.b32.start [1/4] (short) (narrow) %v859_v3, 16 }
  0xe3   :  { %v263_v62 = vpop.permute.xlu2 %262 }
  0xea   :  { %87 = vxpose.xlu1.b32.cont [2/4] (short) (narrow) %v881_v12, 16 }
  0xeb   :  { %v275_v63 = vpop.permute.xlu2 %274 }
  0xf2   :  { %88 = vxpose.xlu1.b32.cont [3/4] (short) (narrow) %v854_v2, 16  ;;  %v286_v2 = vand.u32 127, %v209_v0 }
  0xf4   :  { %v288_v4 = vadd.s32 4294967288, %v286_v2  ;;  %v292_v7 = vadd.s32 4294967280, %v286_v2  ;;  %v300_v8 = vperm.slane %v275_v63, %v286_v2  ;;  %v296_v10 = vadd.s32 4294967272, %v286_v2 }
  0xf5   :  { %v287_v16 = vperm.slane %v263_v62, %v286_v2 }
  0xfa   :  { %89 = vxpose.xlu1.b32.end [4/4] (short) (narrow) %v897_v17, 16 }
  0xfb   :  { %v281_v3 = vpop.permute.xlu2 %280 }
  0xfc   :  { %v303_v13 = vperm.slane %v281_v3, %v292_v7  ;;  %v649_v3 = vld [vmem:[%s1056_s10] sm:$0xff] }
 0x103   :  { %v284_v14 = vpop.permute.xlu2 %283 }
 0x104   :  { %v305_v0 = vperm.slane %v284_v14, %v296_v10 }
 0x10f   :  { %v266_v1 = vpop.permute.xlu1 %265 }
 0x110   :  { %v289_v11 = vperm.slane %v266_v1, %v288_v4 }
 0x112   :  { %v291_v19 = vsel %vm290_vm2, %v289_v11, %v287_v16 }
 0x113   :  { %v269_v9 = vpop.permute.xlu0 %268 }
 0x114   :  { %v293_v15 = vperm.slane %v269_v9, %v292_v7 }
 0x116   :  { %v295_v21 = vsel %vm294_vm3, %v293_v15, %v291_v19 }
 0x117   :  { %v278_v5 = vpop.permute.xlu1 %277 }
 0x118   :  { %v301_v6 = vperm.slane %v278_v5, %v288_v4  ;;  %v650_v4 = vld [vmem:[%s1056_s10 + $0x8] sm:$0xff]  ;;  %v652_v5 = vld [vmem:[%s1056_s10 + $0x18] sm:$0xff] }
 0x11a   :  { %v302_v12 = vsel %vm290_vm2, %v301_v6, %v300_v8 }
 0x11b   :  { %v304_v18 = vsel %vm294_vm3, %v303_v13, %v302_v12 }
 0x11c   :  { %v306_v23 = vsel %vm298_vm4, %v305_v0, %v304_v18 }
 0x11f   :  { %v272_v17 = vpop.permute.xlu1 %271 }
 0x120   :  { %v297_v20 = vperm.slane %v272_v17, %v296_v10 }
 0x122   :  { %v299_v22 = vsel %vm298_vm4, %v297_v20, %v295_v21 }
 0x123   :  { %v308_v24 = vsel %vm307_vm5, %v306_v23, %v299_v22 }
 0x124   :  { %733 = vmatmul.msk.f32.vlgmr.msra.gmra.mxu1 %vm164_vm6, %v308_v24 }
 0x149   :  { %665 = vperm.xlu0 %762, %v651_v28  }
 0x167   :  { %v134_v36 = vpop.trf.xlu0 }
 0x168   :  { %v154_v37 = vadd.f32 %v150_v30, %v134_v36 }
 0x16f   :  { %v135_v38 = vpop.trf.xlu0 }
 0x170   :  { %v155_v41 = vadd.f32 %v151_v33, %v135_v38 }
 0x186   :  { %v102_v31 = vpop.trf.xlu1 }
 0x187   :  { %v152_v32 = vadd.f32 %v150_v30, %v102_v31 }
 0x189   :  { %729 = vmatmul.msk.f32.vlgmr.msra.gmra.mxu0 %vm164_vm6, %v152_v32 }
 0x18e   :  { %v103_v34 = vpop.trf.xlu1 }
 0x18f   :  { %v153_v35 = vadd.f32 %v151_v33, %v103_v34 }
 0x191   :  { %730 = vmatmul.msk.f32.gmra.mxu0 %vm164_vm6, %v153_v35 }
 0x199   :  { %731 = vmatmul.msk.f32.gmra.mxu0 %vm164_vm6, %v154_v37 }
 0x1a1   :  { %732 = vmatmul.msk.f32.gmra.mxu0 %vm164_vm6, %v155_v41  ;;  %v328_v44 = vpop.f32.mrf.mxu1  ;;  %v336_v41 = vld [vmem:[%s1060_s8] sm:$0xf] }
 0x1a2   :  { %v329_v45 = vadd.f32 %v764_v43, %v328_v44  ;;  %739 = vmatpush.msk.msrb.mxu1 %vm541_vm8, %v336_v41  ;;  %744 = vmatpush.msk.msra.mxu3 %vm541_vm8, %v336_v41 }
 0x1a4   :  { %389 = vrot.lane.b32.xlu2 %v329_v45, %s784_s20  ;;  %v331_v47 = vmul.f32 0.35355338, %v329_v45 }
 0x1a6   :  { %v339_v53 = vperm.slane %v331_v47, 0  ;;  %v338_v58 = vrot.slane %v331_v47, 1 }
 0x1a8   :  { %v340_v61 = vperm.slane %v338_v58, 0 }
 0x1fe   :  { %v390_v48 = vpop.permute.xlu2 %389 }
 0x1ff   :  { %v392_v49 = vmul.f32 %v390_v48, %v331_v47 }
 0x201   :  { %738 = vmatmul.msk.f32.vlgmr.msrb.gmra.mxu0 %vm164_vm6, %v392_v49 }
 0x206   :  { %v194_v51 = vpop.f32.mrf.mxu0 }
 0x207   :  { %v195_v52 = vadd.f32 %v765_v50, %v194_v51 }
 0x209   :  { %v343_v54 = vmul.f32 %v339_v53, %v195_v52 }
 0x20b   :  { %734 = vmatmul.msk.f32.vlgmr.msra.gmra.mxu2 %vm164_vm6, %v343_v54 }
 0x20e   :  { %v197_v55 = vpop.f32.mrf.mxu0 }
 0x20f   :  { %v198_v56 = vadd.f32 %v765_v50, %v197_v55 }
 0x211   :  { %v344_v57 = vmul.f32 %v339_v53, %v198_v56 }
 0x213   :  { %735 = vmatmul.msk.f32.gmra.mxu2 %vm164_vm6, %v344_v57 }
 0x216   :  { %v200_v59 = vpop.f32.mrf.mxu0 }
 0x217   :  { %v201_v60 = vadd.f32 %v765_v50, %v200_v59 }
 0x219   :  { %v345_v62 = vmul.f32 %v340_v61, %v201_v60  ;;  %605 = vrot.lane.b32.xlu2 %v201_v60, %s784_s20 }
 0x21b   :  { %736 = vmatmul.msk.f32.gmra.mxu2 %vm164_vm6, %v345_v62 }
 0x21e   :  { %v203_v63 = vpop.f32.mrf.mxu0 }
 0x21f   :  { %v204_v1 = vadd.f32 %v765_v50, %v203_v63 }
 0x221   :  { %v346_v2 = vmul.f32 %v340_v61, %v204_v1  ;;  %607 = vrot.lane.b32.xlu2 %v204_v1, %s784_s20 }
 0x223   :  { %737 = vmatmul.msk.f32.gmra.mxu2 %vm164_vm6, %v346_v2 }
 0x229   :  { %601 = vrot.lane.b32.xlu2 %v195_v52, %s784_s20 }
 0x231   :  { %603 = vrot.lane.b32.xlu2 %v198_v56, %s784_s20 }
 0x239   :  { %635 = vrot.lane.b32.xlu2 %v329_v45, %s785_s4 }
 0x241   :  { %655 = vperm.xlu2 %760, %v649_v3  }
 0x249   :  { %660 = vperm.xlu2 %760, %v650_v4  }
 0x251   :  { %670 = vperm.xlu2 %760, %v652_v5  }
 0x27e   :  { %v413_v18 = vpop.f32.mrf.mxu0 }
 0x27f   :  { %v436_v34 = vrot.slane %v413_v18, 1 }
 0x28e   :  { %v376_v6 = vpop.f32.mrf.mxu2 }
 0x28f   :  { %v417_v8 = vsel %vm416_vm7, %v376_v6, -inf }
 0x296   :  { %v379_v7 = vpop.f32.mrf.mxu2 }
 0x297   :  { %v418_v9 = vsel %vm416_vm7, %v379_v7, -inf }
 0x298   :  { %v419_v10 = vmax.f32 %v417_v8, %v418_v9 }
 0x29a   :  { %v420_v11 = vrot.slane %v419_v10, 4 }
 0x29c   :  { %v421_v12 = vmax.f32 %v419_v10, %v420_v11 }
 0x29e   :  { %v422_v13 = vrot.slane %v421_v12, 2  ;;  %v382_v14 = vpop.f32.mrf.mxu2 }
 0x29f   :  { %v426_v20 = vsel %vm416_vm7, %v382_v14, -inf }
 0x2a0   :  { %v423_v15 = vmax.f32 %v421_v12, %v422_v13 }
 0x2a2   :  { %v424_v16 = vrot.slane %v423_v15, 1 }
 0x2a4   :  { %v425_v17 = vmax.f32 %v423_v15, %v424_v16 }
 0x2a6   :  { %v439_v0 = vmax.f32 %v425_v17, %v413_v18  ;;  %v385_v19 = vpop.f32.mrf.mxu2 }
 0x2a7   :  { %v427_v21 = vsel %vm416_vm7, %v385_v19, -inf }
 0x2a8   :  { %v441_v22 = vperm.slane %v439_v0, 0  ;;  %v428_v23 = vmax.f32 %v426_v20, %v427_v21 }
 0x2aa   :  { %v443_v24 = vsub.f32 %v376_v6, %v441_v22  ;;  %v444_v25 = vsub.f32 %v379_v7, %v441_v22  ;;  %v429_v26 = vrot.slane %v428_v23, 4 }
 0x2ac   :  { %v447_v27 = vmul.f32 1.442695, %v443_v24  ;;  %v449_v28 = vmul.f32 1.442695, %v444_v25  ;;  %v430_v29 = vmax.f32 %v428_v23, %v429_v26 }
 0x2ae   :  { %768 = vpow2.f32 %v447_v27  ;;  %v431_v30 = vrot.slane %v430_v29, 2 }
 0x2af   :  { %770 = vpow2.f32 %v449_v28 }
 0x2b0   :  { %v432_v31 = vmax.f32 %v430_v29, %v431_v30 }
 0x2b2   :  { %v433_v32 = vrot.slane %v432_v31, 1 }
 0x2b4   :  { %v995_v33 = vpop.eup %768  ;;  %v434_v35 = vmax.f32 %v432_v31, %v433_v32 }
 0x2b5   :  { %v997_v36 = vpop.eup %770  ;;  %v463_v37 = vsel %vm416_vm7, %v995_v33, 0.0 }
 0x2b6   :  { %v464_v38 = vsel %vm416_vm7, %v997_v36, 0.0  ;;  %v440_v39 = vmax.f32 %v434_v35, %v436_v34 }
 0x2b7   :  { %v465_v40 = vadd.f32 %v464_v38, %v463_v37  ;;  %v606_v37 = vpop.permute.xlu2 %605 }
 0x2b8   :  { %v442_v42 = vperm.slane %v440_v39, 0  ;;  %v457_v43 = vrot.slane %v440_v39, 7 }
 0x2b9   :  { %v466_v44 = vrot.slane %v465_v40, 4 }
 0x2ba   :  { %v445_v45 = vsub.f32 %v382_v14, %v442_v42  ;;  %v446_v46 = vsub.f32 %v385_v19, %v442_v42  ;;  %v458_v47 = vsel %vm307_vm5, %v457_v43, %v439_v0 }
 0x2bb   :  { %v467_v48 = vadd.f32 %v466_v44, %v465_v40  ;;  %v460_v49 = vsub.f32 %v413_v18, %v458_v47 }
 0x2bc   :  { %v451_v50 = vmul.f32 1.442695, %v445_v45  ;;  %v453_v51 = vmul.f32 1.442695, %v446_v46 }
 0x2bd   :  { %v468_v52 = vrot.slane %v467_v48, 2  ;;  %v461_v53 = vmul.f32 1.442695, %v460_v49 }
 0x2be   :  { %772 = vpow2.f32 %v451_v50 }
 0x2bf   :  { %v469_v54 = vadd.f32 %v468_v52, %v467_v48  ;;  %774 = vpow2.f32 %v453_v51  ;;  %v608_v38 = vpop.permute.xlu2 %607 }
 0x2c0   :  { %776 = vpow2.f32 %v461_v53 }
 0x2c1   :  { %v470_v55 = vrot.slane %v469_v54, 1 }
 0x2c3   :  { %v471_v58 = vadd.f32 %v470_v55, %v469_v54 }
 0x2c4   :  { %v773_v56 = vpop.eup %772 }
 0x2c5   :  { %v775_v57 = vpop.eup %774  ;;  %v472_v59 = vsel %vm416_vm7, %v773_v56, 0.0 }
 0x2c6   :  { %v777_v60 = vpop.eup %776  ;;  %v473_v61 = vsel %vm416_vm7, %v775_v57, 0.0 }
 0x2c7   :  { %v474_v62 = vadd.f32 %v473_v61, %v472_v59  ;;  %v485_v63 = vadd.f32 %v777_v60, %v471_v58  ;;  %v482_v10 = vrot.slane %v777_v60, 1  ;;  %v602_v39 = vpop.permute.xlu2 %601 }
 0x2c9   :  { %v475_v1 = vrot.slane %v474_v62, 4  ;;  %778 = vrcp.f32 %v485_v63  ;;  %v498_v11 = vand.u32 2147483648, %v485_v63  ;;  %v496_v13 = vand.u32 2147483647, %v485_v63 }
 0x2ca   :  { %vm492_vm10 = vweird.f32 %v485_v63 }
 0x2cb   :  { %v476_v2 = vadd.f32 %v475_v1, %v474_v62  ;;  %v499_v16 = vor.u32 1.1754944e-38, %v498_v11  ;;  %vm497_vm12 = vcmp.eq.f32.partialorder %v496_v13, 8.507059e+37  ;;  %v646_v13 = vld [vmem:[%s1061_s9 + $0x8] sm:$0xff] }
 0x2cd   :  { %v477_v3 = vrot.slane %v476_v2, 2 }
 0x2cf   :  { %v779_v4 = vpop.eup %778  ;;  %v478_v5 = vadd.f32 %v477_v3, %v476_v2  ;;  %v604_v41 = vpop.permute.xlu2 %603 }
 0x2d0   :  { %v488_v6 = vmul.f32 %v779_v4, %v485_v63  ;;  %vm493_vm9 = vweird.f32 %v779_v4 }
 0x2d1   :  { %v479_v7 = vrot.slane %v478_v5, 1  ;;  %vm494_vm11 = vmor %vm492_vm10, %vm493_vm9 }
 0x2d2   :  { %v489_v8 = vsub.f32 1.0, %v488_v6 }
 0x2d3   :  { %v480_v9 = vadd.f32 %v479_v7, %v478_v5 }
 0x2d4   :  { %v490_v12 = vmul.f32 %v779_v4, %v489_v8 }
 0x2d5   :  { %v486_v14 = vadd.f32 %v482_v10, %v480_v9 }
 0x2d6   :  { %v491_v15 = vadd.f32 %v779_v4, %v490_v12  ;;  %v645_v12 = vld [vmem:[%s1061_s9] sm:$0xff] }
 0x2d7   :  { %780 = vrcp.f32 %v486_v14  ;;  %v513_v23 = vand.u32 2147483648, %v486_v14  ;;  %v511_v25 = vand.u32 2147483647, %v486_v14  ;;  %vm507_vm14 = vweird.f32 %v486_v14  ;;  %v636_v63 = vpop.permute.xlu2 %635 }
 0x2d8   :  { %v495_v17 = vsel %vm494_vm11, %v779_v4, %v491_v15  ;;  %v648_v15 = vld [vmem:[%s1061_s9 + $0x18] sm:$0xff] }
 0x2d9   :  { %v500_v18 = vsel %vm497_vm12, %v499_v16, %v495_v17  ;;  %v514_v28 = vor.u32 1.1754944e-38, %v513_v23  ;;  %vm512_vm0 = vcmp.eq.f32.partialorder %v511_v25, 8.507059e+37 }
 0x2da   :  { %v517_v0 = vperm.slane %v500_v18, 0 }
 0x2dc   :  { %v519_v19 = vmul.f32 %v995_v33, %v517_v0  ;;  %v520_v26 = vmul.f32 %v997_v36, %v517_v0 }
 0x2dd   :  { %v781_v20 = vpop.eup %780 }
 0x2de   :  { %740 = vmatmul.msk.f32.vlgmr.msrb.gmra.mxu1 %vm416_vm7, %v519_v19  ;;  %v503_v21 = vmul.f32 %v781_v20, %v486_v14  ;;  %vm508_vm13 = vweird.f32 %v781_v20  ;;  %v647_v14 = vld [vmem:[%s1061_s9 + $0x10] sm:$0xff] }
 0x2df   :  { %vm509_vm15 = vmor %vm507_vm14, %vm508_vm13  ;;  %v656_v16 = vpop.permute.xlu2 %655 }
 0x2e0   :  { %v504_v22 = vsub.f32 1.0, %v503_v21  ;;  %v666_v21 = vpop.permute.xlu0 %665 }
 0x2e2   :  { %v505_v24 = vmul.f32 %v781_v20, %v504_v22 }
 0x2e4   :  { %v506_v27 = vadd.f32 %v781_v20, %v505_v24 }
 0x2e6   :  { %741 = vmatmul.msk.f32.gmra.mxu1 %vm416_vm7, %v520_v26  ;;  %v510_v29 = vsel %vm509_vm15, %v781_v20, %v506_v27 }
 0x2e7   :  { %v515_v30 = vsel %vm512_vm0, %v514_v28, %v510_v29  ;;  %v661_v0 = vpop.permute.xlu2 %660 }
 0x2e8   :  { %v525_v31 = vrot.slane %v515_v30, 7  ;;  %v518_v32 = vperm.slane %v515_v30, 0 }
 0x2ea   :  { %v526_v33 = vsel %vm307_vm5, %v525_v31, %v500_v18  ;;  %v521_v35 = vmul.f32 %v773_v56, %v518_v32  ;;  %v522_v36 = vmul.f32 %v775_v57, %v518_v32 }
 0x2eb   :  { %v528_v34 = vmul.f32 %v777_v60, %v526_v33 }
 0x2ed   :  { %745 = vmatmul.msk.f32.vlgmr.msra.gmra.mxu3 %vm416_vm7, %v528_v34 }
 0x2ee   :  { %742 = vmatmul.msk.f32.gmra.mxu1 %vm416_vm7, %v521_v35 }
 0x2ef   :  { %v671_v24 = vpop.permute.xlu2 %670 }
 0x2f6   :  { %743 = vmatmul.msk.f32.gmra.mxu1 %vm416_vm7, %v522_v36 }
 0x35b   :  { %v562_v40 = vpop.f32.mrf.mxu1 }
 0x35c   :  { %v613_v44 = vmul.f32 %v602_v39, %v562_v40 }
 0x35e   :  { %v617_v46 = vsel %vm164_vm6, %v613_v44, 0.0 }
 0x363   :  { %v565_v42 = vpop.f32.mrf.mxu1 }
 0x364   :  { %v614_v43 = vmul.f32 %v604_v41, %v565_v42 }
 0x366   :  { %v618_v45 = vsel %vm164_vm6, %v614_v43, 0.0 }
 0x367   :  { %v619_v47 = vadd.f32 %v618_v45, %v617_v46 }
 0x369   :  { %v620_v49 = vrot.slane %v619_v47, 4 }
 0x36b   :  { %v568_v48 = vpop.f32.mrf.mxu1  ;;  %v621_v51 = vadd.f32 %v620_v49, %v619_v47 }
 0x36c   :  { %v615_v50 = vmul.f32 %v606_v37, %v568_v48 }
 0x36d   :  { %v622_v56 = vrot.slane %v621_v51, 2 }
 0x36e   :  { %v626_v54 = vsel %vm164_vm6, %v615_v50, 0.0 }
 0x36f   :  { %v623_v59 = vadd.f32 %v622_v56, %v621_v51 }
 0x370   :  { %v594_v61 = vpop.f32.mrf.mxu3 }
 0x371   :  { %v624_v1 = vrot.slane %v623_v59, 1  ;;  %v638_v2 = vmul.f32 %v636_v63, %v594_v61 }
 0x373   :  { %v571_v52 = vpop.f32.mrf.mxu1  ;;  %v625_v5 = vadd.f32 %v624_v1, %v623_v59  ;;  %v640_v6 = vrot.slane %v638_v2, 1 }
 0x374   :  { %v616_v53 = vmul.f32 %v608_v38, %v571_v52 }
 0x375   :  { %v643_v9 = vadd.f32 %v638_v2, %v625_v5 }
 0x376   :  { %v627_v55 = vsel %vm164_vm6, %v616_v53, 0.0 }
 0x377   :  { %v628_v57 = vadd.f32 %v627_v55, %v626_v54 }
 0x379   :  { %v629_v58 = vrot.slane %v628_v57, 4 }
 0x37b   :  { %v630_v60 = vadd.f32 %v629_v58, %v628_v57 }
 0x37d   :  { %v631_v62 = vrot.slane %v630_v60, 2 }
 0x37f   :  { %v632_v3 = vadd.f32 %v631_v62, %v630_v60 }
 0x381   :  { %v633_v4 = vrot.slane %v632_v3, 1 }
 0x383   :  { %v634_v7 = vadd.f32 %v633_v4, %v632_v3 }
 0x385   :  { %v644_v8 = vadd.f32 %v640_v6, %v634_v7 }
 0x387   :  { %v675_v10 = vrot.slane %v644_v8, 7 }
 0x389   :  { %v676_v11 = vsel %vm307_vm5, %v675_v10, %v643_v9 }
 0x38a   :  { %746 = vmatpush.xpose.msk.msrb.mxu3 %vm164_vm6, %v676_v11 }
 0x38d   :  { %747 = vmatmul.msk.f32.vlgmr.msrb.gmra.mxu3 %vm164_vm6, %v645_v12 }
 0x395   :  { %748 = vmatmul.msk.f32.gmra.mxu3 %vm164_vm6, %v646_v13 }
 0x39d   :  { %749 = vmatmul.msk.f32.gmra.mxu3 %vm164_vm6, %v647_v14 }
 0x3a5   :  { %750 = vmatmul.msk.f32.gmra.mxu3 %vm164_vm6, %v648_v15 }
 0x410   :  { %v708_v17 = vpop.f32.mrf.mxu3 }
 0x411   :  { %v709_v18 = vadd.f32 %v708_v17, %v656_v16 }
 0x413   :  { %721 = vst.msk [vmem:[%s1062_s11] sm:$0xff] %vm720_vm1, %v709_v18 }
 0x418   :  { %v711_v19 = vpop.f32.mrf.mxu3 }
 0x419   :  { %v712_v20 = vadd.f32 %v711_v19, %v661_v0 }
 0x41b   :  { %722 = vst.msk [vmem:[%s1062_s11 + $0x8] sm:$0xff] %vm720_vm1, %v712_v20 }
 0x420   :  { %v714_v22 = vpop.f32.mrf.mxu3 }
 0x421   :  { %v715_v23 = vadd.f32 %v714_v22, %v666_v21 }
 0x423   :  { %723 = vst.msk [vmem:[%s1062_s11 + $0x10] sm:$0xff] %vm720_vm1, %v715_v23 }
 0x428   :  { %v717_v25 = vpop.f32.mrf.mxu3 }
 0x429   :  { %v718_v26 = vadd.f32 %v717_v25, %v671_v24 }
 0x42b   :  { %724 = vst.msk [vmem:[%s1062_s11 + $0x18] sm:$0xff] %vm720_vm1, %v718_v26 }

</bundles_post_ra>
